<compile_context>
chip_gen: v6e
topology: v6e:2x2x1
jax: 0.10.0
libtpu: 0.0.40
codegen_flags: <defaults>
</compile_context>

<pallas_src>
import functools

import jax
import jax.numpy as jnp
from jax.experimental import pallas as pl
from jax.experimental.pallas import tpu as pltpu

HIDDEN = 128
OUT_DIM = 3
OUT_PAD = 128          # lane-dense padded output width


def _round_up(n, m):
    return pl.cdiv(n, m) * m


def _mlp_kernel(x_ref, w1_ref, b1_ref, w2_ref, b2_ref, w3_ref, b3_ref,
                w4_ref, b4_ref, o_ref):
    """Whole forward pass (4 matmuls + ReLUs) fused in one kernel body.

    x / weights are bf16; accumulation and bias add are f32; intermediates are
    cast back to bf16 before the next MXU pass.
    """
    x = x_ref[...]

    h = jnp.dot(x, w1_ref[...], preferred_element_type=jnp.float32) + b1_ref[...]
    h = jnp.maximum(h, 0.0).astype(jnp.bfloat16)

    h = jnp.dot(h, w2_ref[...], preferred_element_type=jnp.float32) + b2_ref[...]
    h = jnp.maximum(h, 0.0).astype(jnp.bfloat16)

    h = jnp.dot(h, w3_ref[...], preferred_element_type=jnp.float32) + b3_ref[...]
    h = jnp.maximum(h, 0.0).astype(jnp.bfloat16)

    out = jnp.dot(h, w4_ref[...], preferred_element_type=jnp.float32) + b4_ref[...]
    o_ref[...] = out.astype(o_ref.dtype)


@functools.partial(jax.jit, static_argnames=("batch_tile", "single_buffer_weights"))
def _forward_impl(x, w1, b1, w2, b2, w3, b3, w4, b4, *,
                  batch_tile, single_buffer_weights):
    B, servo_num = x.shape
    hid = w1.shape[1]          # 128
    out_dim = w4.shape[1]      # 3

    # Effective batch tile: honour the requested tile but (a) keep >= 2 grid
    # steps so the batch axis can shard across v7x's two TensorCores, and
    # (b) keep the sublane count a multiple of 16 (bf16 packing).
    tile = min(batch_tile, _round_up(max(pl.cdiv(B, 2), 16), 16))
    tile = _round_up(tile, 16)
    B_pad = _round_up(B, tile)
    if B_pad // tile < 2:
        B_pad += tile
    n_tiles = B_pad // tile

    compute_dtype = jnp.bfloat16
    x_p = jnp.pad(x.astype(compute_dtype), ((0, B_pad - B), (0, 0)))
    w1c, w2c, w3c = (w.astype(compute_dtype) for w in (w1, w2, w3))
    b1c, b2c, b3c = (b.astype(jnp.float32) for b in (b1, b2, b3))

    # Lane-dense layer 4: zero-pad the 3-wide output to 128 lanes. Same MXU
    # cost, but the store becomes a full-lane unmasked vst.
    w4p = jnp.zeros((hid, OUT_PAD), compute_dtype).at[:, :out_dim].set(
        w4.astype(compute_dtype))
    b4p = jnp.zeros((1, OUT_PAD), jnp.float32).at[:, :out_dim].set(
        b4.astype(jnp.float32))

    # Weights/biases: constant index_map keeps them resident across grid
    # steps; single-buffer them (no need for double-buffered DMA).
    def resident(shape):
        if single_buffer_weights:
            return pl.BlockSpec(shape, lambda i: (0,) * len(shape),
                                pipeline_mode=pl.Buffered(1))
        return pl.BlockSpec(shape, lambda i: (0,) * len(shape))

    out_pad = pl.pallas_call(
        _mlp_kernel,
        out_shape=jax.ShapeDtypeStruct((B_pad, OUT_PAD), jnp.float32),
        grid_spec=pltpu.PrefetchScalarGridSpec(
            num_scalar_prefetch=0,
            grid=(n_tiles,),
            in_specs=[
                pl.BlockSpec((tile, servo_num), lambda i: (i, 0)),   # x tile
                resident((servo_num, hid)), resident((1, hid)),      # layer 1
                resident((hid, hid)),       resident((1, hid)),      # layer 2
                resident((hid, hid)),       resident((1, hid)),      # layer 3
                resident((hid, OUT_PAD)),   resident((1, OUT_PAD)),  # layer 4
            ],
            out_specs=pl.BlockSpec((tile, OUT_PAD), lambda i: (i, 0)),
        ),
        compiler_params=pltpu.CompilerParams(
            dimension_semantics=("parallel",)),
    )(x_p, w1c, b1c, w2c, b2c, w3c, b3c, w4p, b4p)

    return out_pad[:B, :out_dim].astype(x.dtype)


def predictor_forward(x, params, *, batch_tile=256):
    """x: [B, servoNum] float32; params: dict of weights/biases (see init_params)."""
    args = (x, params["w1"], params["b1"], params["w2"], params["b2"],
            params["w3"], params["b3"], params["w4"], params["b4"])
    try:
        return _forward_impl(*args, batch_tile=batch_tile,
                             single_buffer_weights=True)
    except Exception:
        # pl.Buffered(1) pipeline mode unavailable on this jax/libtpu build;
        # fall back to default (double-buffered) weight specs.
        return _forward_impl(*args, batch_tile=batch_tile,
                             single_buffer_weights=False)


def init_params(key, servo_num, hidden=HIDDEN, out_dim=OUT_DIM, dtype=jnp.float32):
    """PyTorch nn.Linear-style init: U[-1/sqrt(fan_in), 1/sqrt(fan_in)].

    Weights are stored as [in_features, out_features] (transpose of PyTorch's
    nn.Linear weight) so the kernel computes x @ W + b.
    """
    sizes = [(servo_num, hidden), (hidden, hidden), (hidden, hidden), (hidden, out_dim)]
    params = {}
    for idx, (fan_in, fan_out) in enumerate(sizes, start=1):
        key, kw, kb = jax.random.split(key, 3)
        bound = 1.0 / jnp.sqrt(jnp.asarray(fan_in, dtype))
        params[f"w{idx}"] = jax.random.uniform(
            kw, (fan_in, fan_out), dtype, minval=-bound, maxval=bound)
        # biases kept 2D (1, fan_out) for TPU-friendly broadcasting in-kernel
        params[f"b{idx}"] = jax.random.uniform(
            kb, (1, fan_out), dtype, minval=-bound, maxval=bound)
    return params


def _reference_forward(x, p):
    """Pure-JAX reference that mirrors the kernel numerics (bf16 MXU inputs,
    f32 accumulation / bias add)."""
    c = lambda a: a.astype(jnp.bfloat16).astype(jnp.float32)
    hp = jax.lax.Precision.HIGHEST
    h = c(x)
    h = jax.nn.relu(jnp.dot(h, c(p["w1"]), precision=hp) + p["b1"])
    h = c(h)
    h = jax.nn.relu(jnp.dot(h, c(p["w2"]), precision=hp) + p["b2"])
    h = c(h)
    h = jax.nn.relu(jnp.dot(h, c(p["w3"]), precision=hp) + p["b3"])
    h = c(h)
    return jnp.dot(h, c(p["w4"]), precision=hp) + p["b4"]


if __name__ == "__main__":
    servo_num = 8   # number of servos (input features)
    batch = 8       # small test batch (kernel pads/tiles internally)

    key = jax.random.PRNGKey(0)
    key, kx = jax.random.split(key)
    params = init_params(key, servo_num)
    x = jax.random.normal(kx, (batch, servo_num), jnp.float32)

    out = predictor_forward(x, params)          # default batch_tile=256
    out = jax.block_until_ready(out)

    ref = _reference_forward(x, params)
    assert out.shape == (batch, OUT_DIM), out.shape
    assert jnp.allclose(out, ref, atol=1e-3, rtol=1e-3), "mismatch vs reference"

    print("KERNEL_OK")
</pallas_src>

<mosaic_0001>
module attributes {stable_mosaic.version = 11 : i64} {
  func.func @_mlp_kernel(%arg0: i32, %arg1: memref<16x8xbf16, #tpu.memory_space<vmem>>, %arg2: memref<8x128xbf16, #tpu.memory_space<vmem>>, %arg3: memref<1x128xf32, #tpu.memory_space<vmem>>, %arg4: memref<128x128xbf16, #tpu.memory_space<vmem>>, %arg5: memref<1x128xf32, #tpu.memory_space<vmem>>, %arg6: memref<128x128xbf16, #tpu.memory_space<vmem>>, %arg7: memref<1x128xf32, #tpu.memory_space<vmem>>, %arg8: memref<128x128xbf16, #tpu.memory_space<vmem>>, %arg9: memref<1x128xf32, #tpu.memory_space<vmem>>, %arg10: memref<16x128xf32, #tpu.memory_space<vmem>>) attributes {dimension_semantics = [#tpu.dimension_semantics<parallel>], iteration_bounds = array<i64: 2>, scalar_prefetch = 0 : i64, scratch_operands = 0 : i64, tpu.core_type = #tpu.core_type<tc>, window_params = [{transform_indices = @transform_0, window_bounds = array<i64: 16, 8>}, {pipeline_mode = #tpu.pipeline_mode<synchronous>, transform_indices = @transform_1, window_bounds = array<i64: 8, 128>}, {pipeline_mode = #tpu.pipeline_mode<synchronous>, transform_indices = @transform_2, window_bounds = array<i64: 1, 128>}, {pipeline_mode = #tpu.pipeline_mode<synchronous>, transform_indices = @transform_3, window_bounds = array<i64: 128, 128>}, {pipeline_mode = #tpu.pipeline_mode<synchronous>, transform_indices = @transform_4, window_bounds = array<i64: 1, 128>}, {pipeline_mode = #tpu.pipeline_mode<synchronous>, transform_indices = @transform_5, window_bounds = array<i64: 128, 128>}, {pipeline_mode = #tpu.pipeline_mode<synchronous>, transform_indices = @transform_6, window_bounds = array<i64: 1, 128>}, {pipeline_mode = #tpu.pipeline_mode<synchronous>, transform_indices = @transform_7, window_bounds = array<i64: 128, 128>}, {pipeline_mode = #tpu.pipeline_mode<synchronous>, transform_indices = @transform_8, window_bounds = array<i64: 1, 128>}, {transform_indices = @transform_9, window_bounds = array<i64: 16, 128>}]} {
    %c0 = arith.constant 0 : index
    %c0_0 = arith.constant 0 : index
    %0 = vector.load %arg1[%c0, %c0_0] : memref<16x8xbf16, #tpu.memory_space<vmem>>, vector<16x8xbf16>
    %c0_1 = arith.constant 0 : index
    %c0_2 = arith.constant 0 : index
    %1 = vector.load %arg2[%c0_1, %c0_2] : memref<8x128xbf16, #tpu.memory_space<vmem>>, vector<8x128xbf16>
    %cst = arith.constant dense<0.000000e+00> : vector<16x128xf32>
    %2 = tpu.matmul %0, %1, %cst {dimension_numbers = #tpu.dot_dimension_numbers<[1], [0], [0], [1], [0, 0, 1, 1], [], []>} : vector<16x8xbf16>, vector<8x128xbf16>, vector<16x128xf32> -> vector<16x128xf32>
    %c0_3 = arith.constant 0 : index
    %c0_4 = arith.constant 0 : index
    %3 = vector.load %arg3[%c0_3, %c0_4] : memref<1x128xf32, #tpu.memory_space<vmem>>, vector<1x128xf32>
    %4 = vector.broadcast %3 : vector<1x128xf32> to vector<16x128xf32>
    %5 = arith.addf %2, %4 : vector<16x128xf32>
    %cst_5 = arith.constant 0.000000e+00 : f32
    %6 = vector.broadcast %cst_5 : f32 to vector<16x128xf32>
    %7 = arith.maximumf %5, %6 : vector<16x128xf32>
    %8 = arith.truncf %7 : vector<16x128xf32> to vector<16x128xbf16>
    %c0_6 = arith.constant 0 : index
    %c0_7 = arith.constant 0 : index
    %9 = vector.load %arg4[%c0_6, %c0_7] : memref<128x128xbf16, #tpu.memory_space<vmem>>, vector<128x128xbf16>
    %cst_8 = arith.constant dense<0.000000e+00> : vector<16x128xf32>
    %10 = tpu.matmul %8, %9, %cst_8 {dimension_numbers = #tpu.dot_dimension_numbers<[1], [0], [0], [1], [0, 0, 1, 1], [], []>} : vector<16x128xbf16>, vector<128x128xbf16>, vector<16x128xf32> -> vector<16x128xf32>
    %c0_9 = arith.constant 0 : index
    %c0_10 = arith.constant 0 : index
    %11 = vector.load %arg5[%c0_9, %c0_10] : memref<1x128xf32, #tpu.memory_space<vmem>>, vector<1x128xf32>
    %12 = vector.broadcast %11 : vector<1x128xf32> to vector<16x128xf32>
    %13 = arith.addf %10, %12 : vector<16x128xf32>
    %cst_11 = arith.constant 0.000000e+00 : f32
    %14 = vector.broadcast %cst_11 : f32 to vector<16x128xf32>
    %15 = arith.maximumf %13, %14 : vector<16x128xf32>
    %16 = arith.truncf %15 : vector<16x128xf32> to vector<16x128xbf16>
    %c0_12 = arith.constant 0 : index
    %c0_13 = arith.constant 0 : index
    %17 = vector.load %arg6[%c0_12, %c0_13] : memref<128x128xbf16, #tpu.memory_space<vmem>>, vector<128x128xbf16>
    %cst_14 = arith.constant dense<0.000000e+00> : vector<16x128xf32>
    %18 = tpu.matmul %16, %17, %cst_14 {dimension_numbers = #tpu.dot_dimension_numbers<[1], [0], [0], [1], [0, 0, 1, 1], [], []>} : vector<16x128xbf16>, vector<128x128xbf16>, vector<16x128xf32> -> vector<16x128xf32>
    %c0_15 = arith.constant 0 : index
    %c0_16 = arith.constant 0 : index
    %19 = vector.load %arg7[%c0_15, %c0_16] : memref<1x128xf32, #tpu.memory_space<vmem>>, vector<1x128xf32>
    %20 = vector.broadcast %19 : vector<1x128xf32> to vector<16x128xf32>
    %21 = arith.addf %18, %20 : vector<16x128xf32>
    %cst_17 = arith.constant 0.000000e+00 : f32
    %22 = vector.broadcast %cst_17 : f32 to vector<16x128xf32>
    %23 = arith.maximumf %21, %22 : vector<16x128xf32>
    %24 = arith.truncf %23 : vector<16x128xf32> to vector<16x128xbf16>
    %c0_18 = arith.constant 0 : index
    %c0_19 = arith.constant 0 : index
    %25 = vector.load %arg8[%c0_18, %c0_19] : memref<128x128xbf16, #tpu.memory_space<vmem>>, vector<128x128xbf16>
    %cst_20 = arith.constant dense<0.000000e+00> : vector<16x128xf32>
    %26 = tpu.matmul %24, %25, %cst_20 {dimension_numbers = #tpu.dot_dimension_numbers<[1], [0], [0], [1], [0, 0, 1, 1], [], []>} : vector<16x128xbf16>, vector<128x128xbf16>, vector<16x128xf32> -> vector<16x128xf32>
    %c0_21 = arith.constant 0 : index
    %c0_22 = arith.constant 0 : index
    %27 = vector.load %arg9[%c0_21, %c0_22] : memref<1x128xf32, #tpu.memory_space<vmem>>, vector<1x128xf32>
    %28 = vector.broadcast %27 : vector<1x128xf32> to vector<16x128xf32>
    %29 = arith.addf %26, %28 : vector<16x128xf32>
    %c0_23 = arith.constant 0 : index
    %c0_24 = arith.constant 0 : index
    %30 = vector.load %arg10[%c0_23, %c0_24] : memref<16x128xf32, #tpu.memory_space<vmem>>, vector<16x128xf32>
    tpu.vector_store %arg10[%c0_23, %c0_24], %29 {strides = array<i32>} : memref<16x128xf32, #tpu.memory_space<vmem>>, vector<16x128xf32>,
    return
  }
  func.func @transform_0(%arg0: i32) -> (i32, i32) {
    %c0_i32 = arith.constant 0 : i32
    %c0_i32_0 = arith.constant 0 : i32
    return %arg0, %c0_i32 : i32, i32
  }
  func.func @transform_1(%arg0: i32) -> (i32, i32) {
    %c0_i32 = arith.constant 0 : i32
    %c0_i32_0 = arith.constant 0 : i32
    %c0_i32_1 = arith.constant 0 : i32
    return %c0_i32, %c0_i32_0 : i32, i32
  }
  func.func @transform_2(%arg0: i32) -> (i32, i32) {
    %c0_i32 = arith.constant 0 : i32
    %c0_i32_0 = arith.constant 0 : i32
    %c0_i32_1 = arith.constant 0 : i32
    return %c0_i32, %c0_i32_0 : i32, i32
  }
  func.func @transform_3(%arg0: i32) -> (i32, i32) {
    %c0_i32 = arith.constant 0 : i32
    %c0_i32_0 = arith.constant 0 : i32
    %c0_i32_1 = arith.constant 0 : i32
    return %c0_i32, %c0_i32_0 : i32, i32
  }
  func.func @transform_4(%arg0: i32) -> (i32, i32) {
    %c0_i32 = arith.constant 0 : i32
    %c0_i32_0 = arith.constant 0 : i32
    %c0_i32_1 = arith.constant 0 : i32
    return %c0_i32, %c0_i32_0 : i32, i32
  }
  func.func @transform_5(%arg0: i32) -> (i32, i32) {
    %c0_i32 = arith.constant 0 : i32
    %c0_i32_0 = arith.constant 0 : i32
    %c0_i32_1 = arith.constant 0 : i32
    return %c0_i32, %c0_i32_0 : i32, i32
  }
  func.func @transform_6(%arg0: i32) -> (i32, i32) {
    %c0_i32 = arith.constant 0 : i32
    %c0_i32_0 = arith.constant 0 : i32
    %c0_i32_1 = arith.constant 0 : i32
    return %c0_i32, %c0_i32_0 : i32, i32
  }
  func.func @transform_7(%arg0: i32) -> (i32, i32) {
    %c0_i32 = arith.constant 0 : i32
    %c0_i32_0 = arith.constant 0 : i32
    %c0_i32_1 = arith.constant 0 : i32
    return %c0_i32, %c0_i32_0 : i32, i32
  }
  func.func @transform_8(%arg0: i32) -> (i32, i32) {
    %c0_i32 = arith.constant 0 : i32
    %c0_i32_0 = arith.constant 0 : i32
    %c0_i32_1 = arith.constant 0 : i32
    return %c0_i32, %c0_i32_0 : i32, i32
  }
  func.func @transform_9(%arg0: i32) -> (i32, i32) {
    %c0_i32 = arith.constant 0 : i32
    %c0_i32_0 = arith.constant 0 : i32
    return %arg0, %c0_i32 : i32, i32
  }
}

module attributes {stable_mosaic.version = 11 : i64} {
  func.func @_mlp_kernel(%arg0: i32, %arg1: memref<16x8xbf16, #tpu.memory_space<vmem>>, %arg2: memref<8x128xbf16, #tpu.memory_space<vmem>>, %arg3: memref<1x128xf32, #tpu.memory_space<vmem>>, %arg4: memref<128x128xbf16, #tpu.memory_space<vmem>>, %arg5: memref<1x128xf32, #tpu.memory_space<vmem>>, %arg6: memref<128x128xbf16, #tpu.memory_space<vmem>>, %arg7: memref<1x128xf32, #tpu.memory_space<vmem>>, %arg8: memref<128x128xbf16, #tpu.memory_space<vmem>>, %arg9: memref<1x128xf32, #tpu.memory_space<vmem>>, %arg10: memref<16x128xf32, #tpu.memory_space<vmem>>) attributes {dimension_semantics = [#tpu.dimension_semantics<parallel>], iteration_bounds = array<i64: 2>, scalar_prefetch = 0 : i64, scratch_operands = 0 : i64, tpu.core_type = #tpu.core_type<tc>, window_params = [{transform_indices = @transform_0, window_bounds = array<i64: 16, 8>}, {pipeline_mode = #tpu.pipeline_mode<synchronous>, transform_indices = @transform_1, window_bounds = array<i64: 8, 128>}, {pipeline_mode = #tpu.pipeline_mode<synchronous>, transform_indices = @transform_2, window_bounds = array<i64: 1, 128>}, {pipeline_mode = #tpu.pipeline_mode<synchronous>, transform_indices = @transform_3, window_bounds = array<i64: 128, 128>}, {pipeline_mode = #tpu.pipeline_mode<synchronous>, transform_indices = @transform_4, window_bounds = array<i64: 1, 128>}, {pipeline_mode = #tpu.pipeline_mode<synchronous>, transform_indices = @transform_5, window_bounds = array<i64: 128, 128>}, {pipeline_mode = #tpu.pipeline_mode<synchronous>, transform_indices = @transform_6, window_bounds = array<i64: 1, 128>}, {pipeline_mode = #tpu.pipeline_mode<synchronous>, transform_indices = @transform_7, window_bounds = array<i64: 128, 128>}, {pipeline_mode = #tpu.pipeline_mode<synchronous>, transform_indices = @transform_8, window_bounds = array<i64: 1, 128>}, {transform_indices = @transform_9, window_bounds = array<i64: 16, 128>}]} {
    %c0 = arith.constant 0 : index
    %c0_0 = arith.constant 0 : index
    %0 = vector.load %arg1[%c0, %c0_0] : memref<16x8xbf16, #tpu.memory_space<vmem>>, vector<16x8xbf16>
    %c0_1 = arith.constant 0 : index
    %c0_2 = arith.constant 0 : index
    %1 = vector.load %arg2[%c0_1, %c0_2] : memref<8x128xbf16, #tpu.memory_space<vmem>>, vector<8x128xbf16>
    %cst = arith.constant dense<0.000000e+00> : vector<16x128xf32>
    %2 = tpu.matmul %0, %1, %cst {dimension_numbers = #tpu.dot_dimension_numbers<[1], [0], [0], [1], [0, 0, 1, 1], [], []>} : vector<16x8xbf16>, vector<8x128xbf16>, vector<16x128xf32> -> vector<16x128xf32>
    %c0_3 = arith.constant 0 : index
    %c0_4 = arith.constant 0 : index
    %3 = vector.load %arg3[%c0_3, %c0_4] : memref<1x128xf32, #tpu.memory_space<vmem>>, vector<1x128xf32>
    %4 = vector.broadcast %3 : vector<1x128xf32> to vector<16x128xf32>
    %5 = arith.addf %2, %4 : vector<16x128xf32>
    %cst_5 = arith.constant 0.000000e+00 : f32
    %6 = vector.broadcast %cst_5 : f32 to vector<16x128xf32>
    %7 = arith.maximumf %5, %6 : vector<16x128xf32>
    %8 = arith.truncf %7 : vector<16x128xf32> to vector<16x128xbf16>
    %c0_6 = arith.constant 0 : index
    %c0_7 = arith.constant 0 : index
    %9 = vector.load %arg4[%c0_6, %c0_7] : memref<128x128xbf16, #tpu.memory_space<vmem>>, vector<128x128xbf16>
    %cst_8 = arith.constant dense<0.000000e+00> : vector<16x128xf32>
    %10 = tpu.matmul %8, %9, %cst_8 {dimension_numbers = #tpu.dot_dimension_numbers<[1], [0], [0], [1], [0, 0, 1, 1], [], []>} : vector<16x128xbf16>, vector<128x128xbf16>, vector<16x128xf32> -> vector<16x128xf32>
    %c0_9 = arith.constant 0 : index
    %c0_10 = arith.constant 0 : index
    %11 = vector.load %arg5[%c0_9, %c0_10] : memref<1x128xf32, #tpu.memory_space<vmem>>, vector<1x128xf32>
    %12 = vector.broadcast %11 : vector<1x128xf32> to vector<16x128xf32>
    %13 = arith.addf %10, %12 : vector<16x128xf32>
    %cst_11 = arith.constant 0.000000e+00 : f32
    %14 = vector.broadcast %cst_11 : f32 to vector<16x128xf32>
    %15 = arith.maximumf %13, %14 : vector<16x128xf32>
    %16 = arith.truncf %15 : vector<16x128xf32> to vector<16x128xbf16>
    %c0_12 = arith.constant 0 : index
    %c0_13 = arith.constant 0 : index
    %17 = vector.load %arg6[%c0_12, %c0_13] : memref<128x128xbf16, #tpu.memory_space<vmem>>, vector<128x128xbf16>
    %cst_14 = arith.constant dense<0.000000e+00> : vector<16x128xf32>
    %18 = tpu.matmul %16, %17, %cst_14 {dimension_numbers = #tpu.dot_dimension_numbers<[1], [0], [0], [1], [0, 0, 1, 1], [], []>} : vector<16x128xbf16>, vector<128x128xbf16>, vector<16x128xf32> -> vector<16x128xf32>
    %c0_15 = arith.constant 0 : index
    %c0_16 = arith.constant 0 : index
    %19 = vector.load %arg7[%c0_15, %c0_16] : memref<1x128xf32, #tpu.memory_space<vmem>>, vector<1x128xf32>
    %20 = vector.broadcast %19 : vector<1x128xf32> to vector<16x128xf32>
    %21 = arith.addf %18, %20 : vector<16x128xf32>
    %cst_17 = arith.constant 0.000000e+00 : f32
    %22 = vector.broadcast %cst_17 : f32 to vector<16x128xf32>
    %23 = arith.maximumf %21, %22 : vector<16x128xf32>
    %24 = arith.truncf %23 : vector<16x128xf32> to vector<16x128xbf16>
    %c0_18 = arith.constant 0 : index
    %c0_19 = arith.constant 0 : index
    %25 = vector.load %arg8[%c0_18, %c0_19] : memref<128x128xbf16, #tpu.memory_space<vmem>>, vector<128x128xbf16>
    %cst_20 = arith.constant dense<0.000000e+00> : vector<16x128xf32>
    %26 = tpu.matmul %24, %25, %cst_20 {dimension_numbers = #tpu.dot_dimension_numbers<[1], [0], [0], [1], [0, 0, 1, 1], [], []>} : vector<16x128xbf16>, vector<128x128xbf16>, vector<16x128xf32> -> vector<16x128xf32>
    %c0_21 = arith.constant 0 : index
    %c0_22 = arith.constant 0 : index
    %27 = vector.load %arg9[%c0_21, %c0_22] : memref<1x128xf32, #tpu.memory_space<vmem>>, vector<1x128xf32>
    %28 = vector.broadcast %27 : vector<1x128xf32> to vector<16x128xf32>
    %29 = arith.addf %26, %28 : vector<16x128xf32>
    %c0_23 = arith.constant 0 : index
    %c0_24 = arith.constant 0 : index
    %30 = vector.load %arg10[%c0_23, %c0_24] : memref<16x128xf32, #tpu.memory_space<vmem>>, vector<16x128xf32>
    tpu.vector_store %arg10[%c0_23, %c0_24], %29 {strides = array<i32>} : memref<16x128xf32, #tpu.memory_space<vmem>>, vector<16x128xf32>,
    return
  }
  func.func @transform_0(%arg0: i32) -> (i32, i32) {
    %c0_i32 = arith.constant 0 : i32
    %c0_i32_0 = arith.constant 0 : i32
    return %arg0, %c0_i32 : i32, i32
  }
  func.func @transform_1(%arg0: i32) -> (i32, i32) {
    %c0_i32 = arith.constant 0 : i32
    %c0_i32_0 = arith.constant 0 : i32
    %c0_i32_1 = arith.constant 0 : i32
    return %c0_i32, %c0_i32_0 : i32, i32
  }
  func.func @transform_2(%arg0: i32) -> (i32, i32) {
    %c0_i32 = arith.constant 0 : i32
    %c0_i32_0 = arith.constant 0 : i32
    %c0_i32_1 = arith.constant 0 : i32
    return %c0_i32, %c0_i32_0 : i32, i32
  }
  func.func @transform_3(%arg0: i32) -> (i32, i32) {
    %c0_i32 = arith.constant 0 : i32
    %c0_i32_0 = arith.constant 0 : i32
    %c0_i32_1 = arith.constant 0 : i32
    return %c0_i32, %c0_i32_0 : i32, i32
  }
  func.func @transform_4(%arg0: i32) -> (i32, i32) {
    %c0_i32 = arith.constant 0 : i32
    %c0_i32_0 = arith.constant 0 : i32
    %c0_i32_1 = arith.constant 0 : i32
    return %c0_i32, %c0_i32_0 : i32, i32
  }
  func.func @transform_5(%arg0: i32) -> (i32, i32) {
    %c0_i32 = arith.constant 0 : i32
    %c0_i32_0 = arith.constant 0 : i32
    %c0_i32_1 = arith.constant 0 : i32
    return %c0_i32, %c0_i32_0 : i32, i32
  }
  func.func @transform_6(%arg0: i32) -> (i32, i32) {
    %c0_i32 = arith.constant 0 : i32
    %c0_i32_0 = arith.constant 0 : i32
    %c0_i32_1 = arith.constant 0 : i32
    return %c0_i32, %c0_i32_0 : i32, i32
  }
  func.func @transform_7(%arg0: i32) -> (i32, i32) {
    %c0_i32 = arith.constant 0 : i32
    %c0_i32_0 = arith.constant 0 : i32
    %c0_i32_1 = arith.constant 0 : i32
    return %c0_i32, %c0_i32_0 : i32, i32
  }
  func.func @transform_8(%arg0: i32) -> (i32, i32) {
    %c0_i32 = arith.constant 0 : i32
    %c0_i32_0 = arith.constant 0 : i32
    %c0_i32_1 = arith.constant 0 : i32
    return %c0_i32, %c0_i32_0 : i32, i32
  }
  func.func @transform_9(%arg0: i32) -> (i32, i32) {
    %c0_i32 = arith.constant 0 : i32
    %c0_i32_0 = arith.constant 0 : i32
    return %arg0, %c0_i32 : i32, i32
  }
}

</mosaic_0001>

<bundles_post_ra>
// kernel: _forward_impl.1
= control target key start
LH: loop header
LB: loop body
LE: loop exit
PB: predicated region body
PF: predicated region fallthrough
CT: control target
= control target key end

     0   :  { %s1035_s30 = smov 0   ;;  %s1176_s0 = inlined_call_operand.vmem [shape: bf16[32,8], index: 0, kind: input, shape index: {}]   ;;  %s1177_s1 = inlined_call_operand.vmem [shape: bf16[8,128], index: 1, kind: input, shape index: {}]   ;;  %s1178_s2 = inlined_call_operand.vmem [shape: f32[1,128], index: 2, kind: input, shape index: {}]   ;;  %s1179_s3 = inlined_call_operand.vmem [shape: bf16[128,128], index: 3, kind: input, shape index: {}]   ;;  %s1180_s4 = inlined_call_operand.vmem [shape: f32[1,128], index: 4, kind: input, shape index: {}]   ;;  %s1181_s5 = inlined_call_operand.vmem [shape: bf16[128,128], index: 5, kind: input, shape index: {}]   ;;  %s1182_s6 = inlined_call_operand.vmem [shape: f32[1,128], index: 6, kind: input, shape index: {}]   ;;  %s1183_s7 = inlined_call_operand.vmem [shape: bf16[128,128], index: 7, kind: input, shape index: {}]   ;;  %s1184_s8 = inlined_call_operand.vmem [shape: f32[1,128], index: 8, kind: input, shape index: {}]   ;;  %s1185_s9 = inlined_call_operand.vmem [shape: f32[32,128], index: 9, kind: output, shape index: {}]  }
   0x1 LB: > { %s804_s10 = sadd.s32 4294967295, %s981_s30   ;;  %p808_p0 = scmp.ge.s32.totalorder %s981_s30, 1  ;;  %s981_s30 = sphi %s1035_s30, %s19_s30  }
   0x2   : > { %p288_p1 = scmp.lt.s32.totalorder %s981_s30, 3 }
   0x4   : > { %p289_p2 = pnand %p808_p0, %p288_p1 }
   0x5   : > { %s809_s13 = sshll.u32 (!%p289_p2), %s804_s10, 1 }
   0x6   : > { %292 = sbr.rel (%p289_p2) target bundleno = 825 (0x339), region = 56  ;;  %p325_p3 = scmp.lt.s32.totalorder (!%p289_p2), %s809_s13, 3 }
   0xb   : > { %v339_v0 = vld [vmem:[%s1177_s1] sm:$0xf]  ;;  %vm356_vm0 = vcmask 1043456   ;;  %v983_v1 = vmov 0.0   ;;  %vm984_vm1 = vmmov 0   ;;  %v951_v3 = vld [vmem:[%s1179_s3 + $0x38] sm:$0xff]  }
   0xc   : > { %874 = vmatprep.subr.bf16.mxu0 %v983_v1  ;;  %v358_v2 = vsel %vm356_vm0, %v339_v0, 0  ;;  %876 = vmatprep.mubr.msk.bf16.mxu0 %vm984_vm1, %v983_v1  ;;  %s1187_s13 = smov (!%p325_p3, %s809_s13), 3  ;;  %v952_v4 = vld [vmem:[%s1179_s3 + $0x30] sm:$0xff]   ;;  %vm352_vm2 = vcmask 64512   ;;  %v953_v5 = vld [vmem:[%s1179_s3 + $0x28] sm:$0xff]   ;;  %v954_v7 = vld [vmem:[%s1179_s3 + $0x20] sm:$0xff]  }
   0xd   : > { %875 = vmatpush3.bf16.msra.mxu0 %v358_v2  ;;  %880 = vmatprep.subr.bf16.mxu1 %v983_v1  ;;  %s810_s18 = sshll.u32 %s1187_s13, 2  ;;  %v955_v8 = vld [vmem:[%s1179_s3 + $0x18] sm:$0xff]   ;;  %v956_v9 = vld [vmem:[%s1179_s3 + $0x10] sm:$0xff]   ;;  %v957_v10 = vld [vmem:[%s1179_s3 + $0x8] sm:$0xff]   ;;  %s812_s15 = sshll.u32 %s1187_s13, 3 }
   0xe   : > { %881 = vmatpush3.bf16.msra.mxu1 %v951_v3  ;;  %896 = vmatprep.mubr.msk.bf16.mxu1 %vm984_vm1, %v983_v1  ;;  %s328_s21 = scalar_lea.vmem %s1176_s0, %s810_s18  ;;  %v958_v11 = vld [vmem:[%s1179_s3] sm:$0xff]   ;;  %v959_v12 = vld [vmem:[%s1181_s5 + $0x38] sm:$0xff]   ;;  %v960_v13 = vld [vmem:[%s1181_s5 + $0x30] sm:$0xff]   ;;  %s334_s20 = scalar_lea.vmem %s1185_s9, %s812_s15 }
   0xf   : > { %882 = vmatprep.subr.bf16.mxu1 %v983_v1  ;;  %900 = vmatprep.subr.bf16.mxu0 %v983_v1  ;;  %v950_v6 = vld [vmem:[%s328_s21] sm:$0xff]   ;;  %v961_v14 = vld [vmem:[%s1181_s5 + $0x28] sm:$0xff]   ;;  %v963_v16 = vld [vmem:[%s1181_s5 + $0x18] sm:$0xff]  }
  0x10   : > { %877 = vmatmul.mubr.msk.bf16.vlgmr.msra.gmra.mxu0 %vm352_vm2, %v950_v6  ;;  %v962_v15 = vld [vmem:[%s1181_s5 + $0x20] sm:$0xff]   ;;  %v964_v27 = vld [vmem:[%s1181_s5 + $0x10] sm:$0xff]   ;;  %v965_v28 = vld [vmem:[%s1181_s5 + $0x8] sm:$0xff]  }
  0x11   : > { %916 = vmatprep.mubr.msk.bf16.mxu0 %vm984_vm1, %v983_v1  ;;  %901 = vmatpush3.bf16.msra.mxu0 %v959_v12  ;;  %v813_v17 = vld [vmem:[%s1178_s2] ss:$0 sm:$0xff]  ;;  %v967_v30 = vld [vmem:[%s1183_s7 + $0x38] sm:$0xff]   ;;  %v968_v31 = vld [vmem:[%s1183_s7 + $0x30] sm:$0xff]  }
  0x12   : > { %883 = vmatpush3.bf16.msra.mxu1 %v952_v4  ;;  %902 = vmatprep.subr.bf16.mxu0 %v983_v1  ;;  %v966_v29 = vld [vmem:[%s1181_s5] sm:$0xff]   ;;  %v969_v32 = vld [vmem:[%s1183_s7 + $0x28] sm:$0xff]   ;;  %v971_v34 = vld [vmem:[%s1183_s7 + $0x18] sm:$0xff]  }
  0x13   : > { %884 = vmatprep.subr.bf16.mxu1 %v983_v1  ;;  %v970_v33 = vld [vmem:[%s1183_s7 + $0x20] sm:$0xff]   ;;  %v972_v45 = vld [vmem:[%s1183_s7 + $0x10] sm:$0xff]   ;;  %v973_v46 = vld [vmem:[%s1183_s7 + $0x8] sm:$0xff]  }
  0x14   : > { %v816_v35 = vld [vmem:[%s1180_s4] ss:$0 sm:$0xff] }
  0x15   : > { %903 = vmatpush3.bf16.msra.mxu0 %v960_v13  ;;  %v974_v47 = vld [vmem:[%s1183_s7] sm:$0xff]  }
  0x16   : > { %885 = vmatpush3.bf16.msra.mxu1 %v953_v5  ;;  %904 = vmatprep.subr.bf16.mxu0 %v983_v1  ;;  %v825_v48 = vld [vmem:[%s1182_s6] ss:$0 sm:$0xff] }
  0x17   : > { %886 = vmatprep.subr.bf16.mxu1 %v983_v1  ;;  %v834_v58 = vld [vmem:[%s1184_s8] ss:$0 sm:$0xff] }
  0x19   : > { %905 = vmatpush3.bf16.msra.mxu0 %v961_v14 }
  0x1a   : > { %887 = vmatpush3.bf16.msra.mxu1 %v954_v7  ;;  %906 = vmatprep.subr.bf16.mxu0 %v983_v1 }
  0x1b   : > { %888 = vmatprep.subr.bf16.mxu1 %v983_v1 }
  0x1d   : > { %907 = vmatpush3.bf16.msra.mxu0 %v962_v15 }
  0x1e   : > { %889 = vmatpush3.bf16.msra.mxu1 %v955_v8  ;;  %908 = vmatprep.subr.bf16.mxu0 %v983_v1 }
  0x1f   : > { %890 = vmatprep.subr.bf16.mxu1 %v983_v1 }
  0x21   : > { %909 = vmatpush3.bf16.msra.mxu0 %v963_v16 }
  0x22   : > { %891 = vmatpush3.bf16.msra.mxu1 %v956_v9  ;;  %910 = vmatprep.subr.bf16.mxu0 %v983_v1 }
  0x23   : > { %892 = vmatprep.subr.bf16.mxu1 %v983_v1 }
  0x25   : > { %911 = vmatpush3.bf16.msra.mxu0 %v964_v27 }
  0x26   : > { %893 = vmatpush3.bf16.msra.mxu1 %v957_v10  ;;  %912 = vmatprep.subr.bf16.mxu0 %v983_v1 }
  0x27   : > { %894 = vmatprep.subr.bf16.mxu1 %v983_v1 }
  0x29   : > { %913 = vmatpush3.bf16.msra.mxu0 %v965_v28 }
  0x2a   : > { %895 = vmatpush3.bf16.msra.mxu1 %v958_v11  ;;  %914 = vmatprep.subr.bf16.mxu0 %v983_v1 }
  0x2b   : > { %920 = vmatprep.subr.bf16.mxu1 %v983_v1 }
  0x2d   : > { %915 = vmatpush3.bf16.msra.mxu0 %v966_v29 }
  0xd0   : > { %v394_v18 = vpop.f32.mrf.mxu0 }
  0xd1   : > { %v395_v20 = vadd.f32 %v813_v17, %v394_v18 }
  0xd2   : > { %v878_v19 = vpop.f32.mrf.mxu0 }
  0xd3   : > { %v401_v24 = vmax.f32 %v395_v20, 0.0 }
  0xd4   : > { %v397_v21 = vpop.f32.mrf.mxu0 }
  0xd5   : > { %v398_v22 = vadd.f32 %v813_v17, %v397_v21 }
  0xd6   : > { %v879_v23 = vpop.f32.mrf.mxu0 }
  0xd7   : > { %v402_v25 = vmax.f32 %v398_v22, 0.0 }
  0xd9   : > { %v403_v26 = vpack.c.bf16 %v402_v25, %v401_v24 }
  0xdb   : > { %897 = vmatmul.mubr.bf16.vlgmr.msra.gmra.mxu1 %v403_v26 }
  0xdc   : > { %936 = vmatprep.mubr.msk.bf16.mxu1 %vm984_vm1, %v983_v1  ;;  %921 = vmatpush3.bf16.msra.mxu1 %v967_v30 }
  0xdd   : > { %922 = vmatprep.subr.bf16.mxu1 %v983_v1 }
  0xe0   : > { %923 = vmatpush3.bf16.msra.mxu1 %v968_v31 }
  0xe1   : > { %924 = vmatprep.subr.bf16.mxu1 %v983_v1 }
  0xe4   : > { %925 = vmatpush3.bf16.msra.mxu1 %v969_v32 }
  0xe5   : > { %926 = vmatprep.subr.bf16.mxu1 %v983_v1 }
  0xe8   : > { %927 = vmatpush3.bf16.msra.mxu1 %v970_v33 }
  0xe9   : > { %928 = vmatprep.subr.bf16.mxu1 %v983_v1 }
  0xec   : > { %929 = vmatpush3.bf16.msra.mxu1 %v971_v34 }
  0xed   : > { %930 = vmatprep.subr.bf16.mxu1 %v983_v1 }
  0xf0   : > { %931 = vmatpush3.bf16.msra.mxu1 %v972_v45 }
  0xf1   : > { %932 = vmatprep.subr.bf16.mxu1 %v983_v1 }
  0xf4   : > { %933 = vmatpush3.bf16.msra.mxu1 %v973_v46 }
  0xf5   : > { %934 = vmatprep.subr.bf16.mxu1 %v983_v1 }
  0xf8   : > { %935 = vmatpush3.bf16.msra.mxu1 %v974_v47 }
 0x19b   : > { %v509_v36 = vpop.f32.mrf.mxu1 }
 0x19c   : > { %v510_v38 = vadd.f32 %v816_v35, %v509_v36 }
 0x19d   : > { %v898_v37 = vpop.f32.mrf.mxu1 }
 0x19e   : > { %v516_v42 = vmax.f32 %v510_v38, 0.0 }
 0x19f   : > { %v512_v39 = vpop.f32.mrf.mxu1 }
 0x1a0   : > { %v513_v40 = vadd.f32 %v816_v35, %v512_v39 }
 0x1a1   : > { %v899_v41 = vpop.f32.mrf.mxu1 }
 0x1a2   : > { %v517_v43 = vmax.f32 %v513_v40, 0.0 }
 0x1a4   : > { %v518_v44 = vpack.c.bf16 %v517_v43, %v516_v42 }
 0x1a6   : > { %917 = vmatmul.mubr.bf16.vlgmr.msra.gmra.mxu0 %v518_v44 }
 0x266   : > { %v624_v49 = vpop.f32.mrf.mxu0 }
 0x267   : > { %v625_v51 = vadd.f32 %v825_v48, %v624_v49 }
 0x268   : > { %v918_v50 = vpop.f32.mrf.mxu0 }
 0x269   : > { %v631_v55 = vmax.f32 %v625_v51, 0.0 }
 0x26a   : > { %v627_v52 = vpop.f32.mrf.mxu0 }
 0x26b   : > { %v628_v53 = vadd.f32 %v825_v48, %v627_v52 }
 0x26c   : > { %v919_v54 = vpop.f32.mrf.mxu0 }
 0x26d   : > { %v632_v56 = vmax.f32 %v628_v53, 0.0 }
 0x26f   : > { %v633_v57 = vpack.c.bf16 %v632_v56, %v631_v55 }
 0x271   : > { %937 = vmatmul.mubr.bf16.vlgmr.msra.gmra.mxu1 %v633_v57 }
 0x331   : > { %v739_v59 = vpop.f32.mrf.mxu1 }
 0x332   : > { %v740_v60 = vadd.f32 %v834_v58, %v739_v59 }
 0x333   : > { %v938_v61 = vpop.f32.mrf.mxu1 }
 0x334   : > { %746 = vst [vmem:[%s334_s20] sm:$0xff] %v740_v60 }
 0x335   : > { %v742_v62 = vpop.f32.mrf.mxu1 }
 0x336   : > { %v743_v63 = vadd.f32 %v834_v58, %v742_v62 }
 0x337   : > { %v939_v0 = vpop.f32.mrf.mxu1 }
 0x338   : > { %747 = vst [vmem:[%s334_s20 + $0x8] sm:$0xff] %v743_v63 }
 0x339 PF: > { %s19_s30 = sadd.s32 1, %s981_s30  }
 0x33a   : > { %p16_p4 = scmp.ge.s32.totalorder %s19_s30, 4  }
 0x33c   :  { %18 = sbr.rel (!%p16_p4) target bundleno = 1 (0x1), region = 86 }

// kernel: _forward_impl.1
= control target key start
LH: loop header
LB: loop body
LE: loop exit
PB: predicated region body
PF: predicated region fallthrough
CT: control target
= control target key end

     0   :  { %s1035_s30 = smov 0   ;;  %s1176_s0 = inlined_call_operand.vmem [shape: bf16[32,8], index: 0, kind: input, shape index: {}]   ;;  %s1177_s1 = inlined_call_operand.vmem [shape: bf16[8,128], index: 1, kind: input, shape index: {}]   ;;  %s1178_s2 = inlined_call_operand.vmem [shape: f32[1,128], index: 2, kind: input, shape index: {}]   ;;  %s1179_s3 = inlined_call_operand.vmem [shape: bf16[128,128], index: 3, kind: input, shape index: {}]   ;;  %s1180_s4 = inlined_call_operand.vmem [shape: f32[1,128], index: 4, kind: input, shape index: {}]   ;;  %s1181_s5 = inlined_call_operand.vmem [shape: bf16[128,128], index: 5, kind: input, shape index: {}]   ;;  %s1182_s6 = inlined_call_operand.vmem [shape: f32[1,128], index: 6, kind: input, shape index: {}]   ;;  %s1183_s7 = inlined_call_operand.vmem [shape: bf16[128,128], index: 7, kind: input, shape index: {}]   ;;  %s1184_s8 = inlined_call_operand.vmem [shape: f32[1,128], index: 8, kind: input, shape index: {}]   ;;  %s1185_s9 = inlined_call_operand.vmem [shape: f32[32,128], index: 9, kind: output, shape index: {}]  }
   0x1 LB: > { %s804_s10 = sadd.s32 4294967295, %s981_s30   ;;  %p808_p0 = scmp.ge.s32.totalorder %s981_s30, 1  ;;  %s981_s30 = sphi %s1035_s30, %s19_s30  }
   0x2   : > { %p288_p1 = scmp.lt.s32.totalorder %s981_s30, 3 }
   0x4   : > { %p289_p2 = pnand %p808_p0, %p288_p1 }
   0x5   : > { %s809_s13 = sshll.u32 (!%p289_p2), %s804_s10, 1 }
   0x6   : > { %292 = sbr.rel (%p289_p2) target bundleno = 825 (0x339), region = 56  ;;  %p325_p3 = scmp.lt.s32.totalorder (!%p289_p2), %s809_s13, 3 }
   0xb   : > { %v339_v0 = vld [vmem:[%s1177_s1] sm:$0xf]  ;;  %vm356_vm0 = vcmask 1043456   ;;  %v983_v1 = vmov 0.0   ;;  %vm984_vm1 = vmmov 0   ;;  %v951_v3 = vld [vmem:[%s1179_s3 + $0x38] sm:$0xff]  }
   0xc   : > { %874 = vmatprep.subr.bf16.mxu0 %v983_v1  ;;  %v358_v2 = vsel %vm356_vm0, %v339_v0, 0  ;;  %876 = vmatprep.mubr.msk.bf16.mxu0 %vm984_vm1, %v983_v1  ;;  %s1187_s13 = smov (!%p325_p3, %s809_s13), 3  ;;  %v952_v4 = vld [vmem:[%s1179_s3 + $0x30] sm:$0xff]   ;;  %vm352_vm2 = vcmask 64512   ;;  %v953_v5 = vld [vmem:[%s1179_s3 + $0x28] sm:$0xff]   ;;  %v954_v7 = vld [vmem:[%s1179_s3 + $0x20] sm:$0xff]  }
   0xd   : > { %875 = vmatpush3.bf16.msra.mxu0 %v358_v2  ;;  %880 = vmatprep.subr.bf16.mxu1 %v983_v1  ;;  %s810_s18 = sshll.u32 %s1187_s13, 2  ;;  %v955_v8 = vld [vmem:[%s1179_s3 + $0x18] sm:$0xff]   ;;  %v956_v9 = vld [vmem:[%s1179_s3 + $0x10] sm:$0xff]   ;;  %v957_v10 = vld [vmem:[%s1179_s3 + $0x8] sm:$0xff]   ;;  %s812_s15 = sshll.u32 %s1187_s13, 3 }
   0xe   : > { %881 = vmatpush3.bf16.msra.mxu1 %v951_v3  ;;  %896 = vmatprep.mubr.msk.bf16.mxu1 %vm984_vm1, %v983_v1  ;;  %s328_s21 = scalar_lea.vmem %s1176_s0, %s810_s18  ;;  %v958_v11 = vld [vmem:[%s1179_s3] sm:$0xff]   ;;  %v959_v12 = vld [vmem:[%s1181_s5 + $0x38] sm:$0xff]   ;;  %v960_v13 = vld [vmem:[%s1181_s5 + $0x30] sm:$0xff]   ;;  %s334_s20 = scalar_lea.vmem %s1185_s9, %s812_s15 }
   0xf   : > { %882 = vmatprep.subr.bf16.mxu1 %v983_v1  ;;  %900 = vmatprep.subr.bf16.mxu0 %v983_v1  ;;  %v950_v6 = vld [vmem:[%s328_s21] sm:$0xff]   ;;  %v961_v14 = vld [vmem:[%s1181_s5 + $0x28] sm:$0xff]   ;;  %v963_v16 = vld [vmem:[%s1181_s5 + $0x18] sm:$0xff]  }
  0x10   : > { %877 = vmatmul.mubr.msk.bf16.vlgmr.msra.gmra.mxu0 %vm352_vm2, %v950_v6  ;;  %v962_v15 = vld [vmem:[%s1181_s5 + $0x20] sm:$0xff]   ;;  %v964_v27 = vld [vmem:[%s1181_s5 + $0x10] sm:$0xff]   ;;  %v965_v28 = vld [vmem:[%s1181_s5 + $0x8] sm:$0xff]  }
  0x11   : > { %916 = vmatprep.mubr.msk.bf16.mxu0 %vm984_vm1, %v983_v1  ;;  %901 = vmatpush3.bf16.msra.mxu0 %v959_v12  ;;  %v813_v17 = vld [vmem:[%s1178_s2] ss:$0 sm:$0xff]  ;;  %v967_v30 = vld [vmem:[%s1183_s7 + $0x38] sm:$0xff]   ;;  %v968_v31 = vld [vmem:[%s1183_s7 + $0x30] sm:$0xff]  }
  0x12   : > { %883 = vmatpush3.bf16.msra.mxu1 %v952_v4  ;;  %902 = vmatprep.subr.bf16.mxu0 %v983_v1  ;;  %v966_v29 = vld [vmem:[%s1181_s5] sm:$0xff]   ;;  %v969_v32 = vld [vmem:[%s1183_s7 + $0x28] sm:$0xff]   ;;  %v971_v34 = vld [vmem:[%s1183_s7 + $0x18] sm:$0xff]  }
  0x13   : > { %884 = vmatprep.subr.bf16.mxu1 %v983_v1  ;;  %v970_v33 = vld [vmem:[%s1183_s7 + $0x20] sm:$0xff]   ;;  %v972_v45 = vld [vmem:[%s1183_s7 + $0x10] sm:$0xff]   ;;  %v973_v46 = vld [vmem:[%s1183_s7 + $0x8] sm:$0xff]  }
  0x14   : > { %v816_v35 = vld [vmem:[%s1180_s4] ss:$0 sm:$0xff] }
  0x15   : > { %903 = vmatpush3.bf16.msra.mxu0 %v960_v13  ;;  %v974_v47 = vld [vmem:[%s1183_s7] sm:$0xff]  }
  0x16   : > { %885 = vmatpush3.bf16.msra.mxu1 %v953_v5  ;;  %904 = vmatprep.subr.bf16.mxu0 %v983_v1  ;;  %v825_v48 = vld [vmem:[%s1182_s6] ss:$0 sm:$0xff] }
  0x17   : > { %886 = vmatprep.subr.bf16.mxu1 %v983_v1  ;;  %v834_v58 = vld [vmem:[%s1184_s8] ss:$0 sm:$0xff] }
  0x19   : > { %905 = vmatpush3.bf16.msra.mxu0 %v961_v14 }
  0x1a   : > { %887 = vmatpush3.bf16.msra.mxu1 %v954_v7  ;;  %906 = vmatprep.subr.bf16.mxu0 %v983_v1 }
  0x1b   : > { %888 = vmatprep.subr.bf16.mxu1 %v983_v1 }
  0x1d   : > { %907 = vmatpush3.bf16.msra.mxu0 %v962_v15 }
  0x1e   : > { %889 = vmatpush3.bf16.msra.mxu1 %v955_v8  ;;  %908 = vmatprep.subr.bf16.mxu0 %v983_v1 }
  0x1f   : > { %890 = vmatprep.subr.bf16.mxu1 %v983_v1 }
  0x21   : > { %909 = vmatpush3.bf16.msra.mxu0 %v963_v16 }
  0x22   : > { %891 = vmatpush3.bf16.msra.mxu1 %v956_v9  ;;  %910 = vmatprep.subr.bf16.mxu0 %v983_v1 }
  0x23   : > { %892 = vmatprep.subr.bf16.mxu1 %v983_v1 }
  0x25   : > { %911 = vmatpush3.bf16.msra.mxu0 %v964_v27 }
  0x26   : > { %893 = vmatpush3.bf16.msra.mxu1 %v957_v10  ;;  %912 = vmatprep.subr.bf16.mxu0 %v983_v1 }
  0x27   : > { %894 = vmatprep.subr.bf16.mxu1 %v983_v1 }
  0x29   : > { %913 = vmatpush3.bf16.msra.mxu0 %v965_v28 }
  0x2a   : > { %895 = vmatpush3.bf16.msra.mxu1 %v958_v11  ;;  %914 = vmatprep.subr.bf16.mxu0 %v983_v1 }
  0x2b   : > { %920 = vmatprep.subr.bf16.mxu1 %v983_v1 }
  0x2d   : > { %915 = vmatpush3.bf16.msra.mxu0 %v966_v29 }
  0xd0   : > { %v394_v18 = vpop.f32.mrf.mxu0 }
  0xd1   : > { %v395_v20 = vadd.f32 %v813_v17, %v394_v18 }
  0xd2   : > { %v878_v19 = vpop.f32.mrf.mxu0 }
  0xd3   : > { %v401_v24 = vmax.f32 %v395_v20, 0.0 }
  0xd4   : > { %v397_v21 = vpop.f32.mrf.mxu0 }
  0xd5   : > { %v398_v22 = vadd.f32 %v813_v17, %v397_v21 }
  0xd6   : > { %v879_v23 = vpop.f32.mrf.mxu0 }
  0xd7   : > { %v402_v25 = vmax.f32 %v398_v22, 0.0 }
  0xd9   : > { %v403_v26 = vpack.c.bf16 %v402_v25, %v401_v24 }
  0xdb   : > { %897 = vmatmul.mubr.bf16.vlgmr.msra.gmra.mxu1 %v403_v26 }
  0xdc   : > { %936 = vmatprep.mubr.msk.bf16.mxu1 %vm984_vm1, %v983_v1  ;;  %921 = vmatpush3.bf16.msra.mxu1 %v967_v30 }
  0xdd   : > { %922 = vmatprep.subr.bf16.mxu1 %v983_v1 }
  0xe0   : > { %923 = vmatpush3.bf16.msra.mxu1 %v968_v31 }
  0xe1   : > { %924 = vmatprep.subr.bf16.mxu1 %v983_v1 }
  0xe4   : > { %925 = vmatpush3.bf16.msra.mxu1 %v969_v32 }
  0xe5   : > { %926 = vmatprep.subr.bf16.mxu1 %v983_v1 }
  0xe8   : > { %927 = vmatpush3.bf16.msra.mxu1 %v970_v33 }
  0xe9   : > { %928 = vmatprep.subr.bf16.mxu1 %v983_v1 }
  0xec   : > { %929 = vmatpush3.bf16.msra.mxu1 %v971_v34 }
  0xed   : > { %930 = vmatprep.subr.bf16.mxu1 %v983_v1 }
  0xf0   : > { %931 = vmatpush3.bf16.msra.mxu1 %v972_v45 }
  0xf1   : > { %932 = vmatprep.subr.bf16.mxu1 %v983_v1 }
  0xf4   : > { %933 = vmatpush3.bf16.msra.mxu1 %v973_v46 }
  0xf5   : > { %934 = vmatprep.subr.bf16.mxu1 %v983_v1 }
  0xf8   : > { %935 = vmatpush3.bf16.msra.mxu1 %v974_v47 }
 0x19b   : > { %v509_v36 = vpop.f32.mrf.mxu1 }
 0x19c   : > { %v510_v38 = vadd.f32 %v816_v35, %v509_v36 }
 0x19d   : > { %v898_v37 = vpop.f32.mrf.mxu1 }
 0x19e   : > { %v516_v42 = vmax.f32 %v510_v38, 0.0 }
 0x19f   : > { %v512_v39 = vpop.f32.mrf.mxu1 }
 0x1a0   : > { %v513_v40 = vadd.f32 %v816_v35, %v512_v39 }
 0x1a1   : > { %v899_v41 = vpop.f32.mrf.mxu1 }
 0x1a2   : > { %v517_v43 = vmax.f32 %v513_v40, 0.0 }
 0x1a4   : > { %v518_v44 = vpack.c.bf16 %v517_v43, %v516_v42 }
 0x1a6   : > { %917 = vmatmul.mubr.bf16.vlgmr.msra.gmra.mxu0 %v518_v44 }
 0x266   : > { %v624_v49 = vpop.f32.mrf.mxu0 }
 0x267   : > { %v625_v51 = vadd.f32 %v825_v48, %v624_v49 }
 0x268   : > { %v918_v50 = vpop.f32.mrf.mxu0 }
 0x269   : > { %v631_v55 = vmax.f32 %v625_v51, 0.0 }
 0x26a   : > { %v627_v52 = vpop.f32.mrf.mxu0 }
 0x26b   : > { %v628_v53 = vadd.f32 %v825_v48, %v627_v52 }
 0x26c   : > { %v919_v54 = vpop.f32.mrf.mxu0 }
 0x26d   : > { %v632_v56 = vmax.f32 %v628_v53, 0.0 }
 0x26f   : > { %v633_v57 = vpack.c.bf16 %v632_v56, %v631_v55 }
 0x271   : > { %937 = vmatmul.mubr.bf16.vlgmr.msra.gmra.mxu1 %v633_v57 }
 0x331   : > { %v739_v59 = vpop.f32.mrf.mxu1 }
 0x332   : > { %v740_v60 = vadd.f32 %v834_v58, %v739_v59 }
 0x333   : > { %v938_v61 = vpop.f32.mrf.mxu1 }
 0x334   : > { %746 = vst [vmem:[%s334_s20] sm:$0xff] %v740_v60 }
 0x335   : > { %v742_v62 = vpop.f32.mrf.mxu1 }
 0x336   : > { %v743_v63 = vadd.f32 %v834_v58, %v742_v62 }
 0x337   : > { %v939_v0 = vpop.f32.mrf.mxu1 }
 0x338   : > { %747 = vst [vmem:[%s334_s20 + $0x8] sm:$0xff] %v743_v63 }
 0x339 PF: > { %s19_s30 = sadd.s32 1, %s981_s30  }
 0x33a   : > { %p16_p4 = scmp.ge.s32.totalorder %s19_s30, 4  }
 0x33c   :  { %18 = sbr.rel (!%p16_p4) target bundleno = 1 (0x1), region = 86 }

</bundles_post_ra>
